<compile_context>
chip_gen: v5e
topology: v5e:2x2
jax: 0.10.0
libtpu: 0.0.40
codegen_flags: <defaults>
</compile_context>

<pallas_src>
import functools

import jax
import jax.numpy as jnp
from jax import lax
from jax.experimental import pallas as pl
from jax.experimental.pallas import tpu as pltpu


def _triplet_kernel(lab_smem, emb_hbm, lab_col_ref, lab_row_ref,
                    loss_ref, pos_ref, dm_ref, *, margin, eps, tj, batch):
    B = batch
    pid = pl.program_id(0)

    # Small iotas only (no live (B,B) index matrices).
    sub_iota = lax.broadcasted_iota(jnp.int32, (B, 1), 0)    # k (sublanes)
    lane_iota = lax.broadcasted_iota(jnp.int32, (1, B), 1)   # i (lanes)

    # ---- one-time init: outputs + Euclidean distance matrix ----------------
    @pl.when(pid == 0)
    def _init():
        loss_ref[...] = jnp.zeros_like(loss_ref)
        pos_ref[...] = jnp.zeros_like(pos_ref)

        E = emb_hbm.shape[1]

        def compute_dm(xbuf, sem):
            cp = pltpu.make_async_copy(emb_hbm, xbuf, sem)
            cp.start()
            cp.wait()
            x = xbuf[...].astype(jnp.float32)                 # (B, E)
            xsq = x * x
            # Squared norms without a (B,B) eye: lane reduce (column form) and
            # an MXU matvec against ones (row form).
            sq_col = jnp.sum(xsq, axis=1, keepdims=True)      # (B, 1)
            sq_row = lax.dot_general(                         # (1, B)
                jnp.ones((1, E), jnp.float32), xsq,
                (((1,), (1,)), ((), ())),
                preferred_element_type=jnp.float32)
            dot = lax.dot_general(x, x, (((1,), (1,)), ((), ())),
                                  preferred_element_type=jnp.float32)  # x x^T
            dsq = jnp.maximum(sq_row - 2.0 * dot + sq_col, 0.0)
            zmask = (dsq == 0.0).astype(jnp.float32)
            dm_ref[...] = jnp.sqrt(dsq + zmask * eps) * (1.0 - zmask)

        # Scoped: the (B,E) buffer only lives during init, not the whole grid.
        pl.run_scoped(compute_dm,
                      pltpu.VMEM(emb_hbm.shape, jnp.float32),
                      pltpu.SemaphoreType.DMA)

    # ---- grid-step invariants (amortized over the tj inner iterations) -----
    lab_col = lab_col_ref[...]                                # (B,1) labels[k]
    lab_row = lab_row_ref[...]                                # (1,B) labels[i]
    # base[k, i] = margin - D[i, k] when (i != k and labels[i] != labels[k]),
    # else -inf.  The -inf also covers k == j whenever the per-j row mask
    # (labels[i] == labels[j]) passes, so no per-iteration column mask needed.
    inv_valid = (sub_iota != lane_iota) & (lab_col != lab_row)
    base = jnp.where(inv_valid, margin - dm_ref[...], -jnp.inf)

    j0 = pl.multiple_of(pid * tj, tj)
    ones_col = jnp.ones((B, 1), jnp.float32)                  # MXU-reduce rhs

    def body(jj, carry):
        loss_vec, pos_vec = carry
        j = j0 + jj
        valid = j < B                                         # tail guard
        j_safe = jnp.where(valid, j, 0)

        lj = lab_smem[j_safe]                                 # labels[j] scalar
        d_j = dm_ref[pl.ds(j_safe, 1), :]                     # (1,B)  D[i, j]

        # Row mask: i != j and labels[i] == labels[j] (and in-range tail),
        # folded into the (1,B) row at (1,B) cost.
        rb = (lane_iota != j) & (lab_row == lj) & valid       # (1,B)
        d_j_masked = jnp.where(rb, d_j, -jnp.inf)             # (1,B)

        # t[k, i] = D[i,j] - D[i,k] + margin; invalid entries are -inf.
        contrib = jnp.maximum(d_j_masked + base, 0.0)         # (B,B) relu
        ind = (contrib > eps).astype(jnp.float32)             # (B,B)

        # Lane reductions on the (otherwise idle) MXU instead of the XLU.
        loss_vec = loss_vec + lax.dot_general(
            contrib, ones_col, (((1,), (0,)), ((), ())),
            preferred_element_type=jnp.float32)
        pos_vec = pos_vec + lax.dot_general(
            ind, ones_col, (((1,), (0,)), ((), ())),
            preferred_element_type=jnp.float32)
        return loss_vec, pos_vec

    zeros = jnp.zeros((B, 1), jnp.float32)
    unroll = True if tj <= 16 else 4
    loss_vec, pos_vec = lax.fori_loop(0, tj, body, (zeros, zeros),
                                      unroll=unroll)

    # Sublane reduce once per grid step (deferred reduction).
    loss_ref[...] += jnp.sum(loss_vec, axis=0, keepdims=True)
    pos_ref[...] += jnp.sum(pos_vec, axis=0, keepdims=True)


def batch_triplet_loss(embeddings, labels, *, margin=1.0, eps=1e-8):
    """Returns (loss, num_valid_triplets) matching BatchTtripletLoss.forward."""
    B, E = embeddings.shape
    lab = labels.astype(jnp.int32)
    lab_col = lab.reshape(B, 1)
    lab_row = lab.reshape(1, B)

    tj = min(B, 128)                 # positives handled per grid step
    nj = pl.cdiv(B, tj)

    kernel = functools.partial(_triplet_kernel, margin=float(margin),
                               eps=float(eps), tj=tj, batch=B)

    grid_spec = pltpu.PrefetchScalarGridSpec(
        num_scalar_prefetch=1,                         # labels -> SMEM
        grid=(nj,),
        in_specs=[
            pl.BlockSpec(memory_space=pl.ANY),                 # embeddings (HBM)
            pl.BlockSpec((B, 1), lambda p, lab_ref: (0, 0)),   # labels as column
            pl.BlockSpec((1, B), lambda p, lab_ref: (0, 0)),   # labels as row
        ],
        out_specs=(
            pl.BlockSpec((1, 1), lambda p, lab_ref: (0, 0)),   # sum of losses
            pl.BlockSpec((1, 1), lambda p, lab_ref: (0, 0)),   # # positive losses
        ),
        scratch_shapes=[pltpu.VMEM((B, B), jnp.float32)],      # distance matrix
    )

    # Scoped-VMEM limit clamped to the actual device capacity (v7x has only
    # 64 MiB physical; v5e's scoped default is 16 MiB).  Budget: D scratch +
    # materialized `base` + ~2 live (B,B) loop temporaries + init (B,E) buffer.
    try:
        info = pltpu.get_tpu_info()
        phys_vmem = int(getattr(info, "vmem_capacity_bytes", 64 * 1024 * 1024))
    except Exception:
        phys_vmem = 64 * 1024 * 1024
    vmem_needed = 4 * (4 * B * B) + 4 * B * E + (2 << 20)
    vmem_limit = int(min(max(vmem_needed, 32 * 1024 * 1024),
                         phys_vmem - (2 << 20)))

    loss_sum, pos_cnt = pl.pallas_call(
        kernel,
        out_shape=(jax.ShapeDtypeStruct((1, 1), jnp.float32),
                   jax.ShapeDtypeStruct((1, 1), jnp.float32)),
        grid_spec=grid_spec,
        compiler_params=pltpu.CompilerParams(
            dimension_semantics=("arbitrary",),        # scratch/outputs persist
            vmem_limit_bytes=vmem_limit),
    )(lab, embeddings.astype(jnp.float32), lab_col, lab_row)

    loss = loss_sum[0, 0] / (pos_cnt[0, 0] + eps)

    # num_valid_triplets analytically from label counts:
    #   sum_i (n_{c_i} - 1) * (B - n_{c_i})
    n_i = jnp.sum((lab_col == lab_row).astype(jnp.float32), axis=1)
    n_triplets = jnp.sum((n_i - 1.0) * (B - n_i))
    return loss, n_triplets


def reference_loss(embeddings, labels, *, margin=1.0, eps=1e-8):
    """Pure-JAX mirror of the PyTorch module (for correctness check)."""
    x = embeddings.astype(jnp.float32)
    dot = x @ x.T
    sq = jnp.diag(dot)
    dm = sq[None, :] - 2.0 * dot + sq[:, None]
    dm = jnp.maximum(dm, 0.0)
    zm = (dm == 0.0).astype(jnp.float32)
    dm = jnp.sqrt(dm + zm * eps) * (1.0 - zm)

    t = dm[:, :, None] - dm[:, None, :] + margin

    B = labels.shape[0]
    neq = ~jnp.eye(B, dtype=bool)
    distinct = neq[:, :, None] & neq[:, None, :] & neq[None, :, :]
    leq = labels[None, :] == labels[:, None]
    valid = leq[:, :, None] & (~leq[:, None, :])
    mask = (distinct & valid).astype(jnp.float32)

    t = jnp.maximum(t * mask, 0.0)
    npos = jnp.sum((t > eps).astype(jnp.float32))
    return jnp.sum(t) / (npos + eps), jnp.sum(mask)


if __name__ == "__main__":
    B, E, C = 8, 32, 3   # small shapes consistent with forward: (B,E) embs, (B,) labels
    key = jax.random.PRNGKey(0)
    k_emb, k_lab = jax.random.split(key)
    embeddings = jax.random.normal(k_emb, (B, E), dtype=jnp.float32)
    labels = jax.random.randint(k_lab, (B,), 0, C, dtype=jnp.int32)

    loss, n_triplets = batch_triplet_loss(embeddings, labels, margin=1.0)
    loss = jax.block_until_ready(loss)
    n_triplets = jax.block_until_ready(n_triplets)

    ref_loss, ref_n = reference_loss(embeddings, labels, margin=1.0)
    assert jnp.allclose(loss, ref_loss, rtol=1e-4, atol=1e-4), (loss, ref_loss)
    assert jnp.allclose(n_triplets, ref_n), (n_triplets, ref_n)

    print("KERNEL_OK")
</pallas_src>

<mosaic_0001>
module attributes {stable_mosaic.version = 11 : i64} {
  func.func @_triplet_kernel(%arg0: i32, %arg1: memref<8xi32, #tpu.memory_space<smem>>, %arg2: memref<8x32xf32, #tpu.memory_space<any>>, %arg3: memref<8x1xi32, #tpu.memory_space<vmem>>, %arg4: memref<1x8xi32, #tpu.memory_space<vmem>>, %arg5: memref<1x1xf32, #tpu.memory_space<vmem>>, %arg6: memref<1x1xf32, #tpu.memory_space<vmem>>, %arg7: memref<8x8xf32, #tpu.memory_space<vmem>>) attributes {dimension_semantics = [#tpu.dimension_semantics<arbitrary>], iteration_bounds = array<i64: 1>, scalar_prefetch = 1 : i64, scratch_operands = 1 : i64, tpu.core_type = #tpu.core_type<tc>, window_params = [{}, {pipeline_mode = #tpu.pipeline_mode<synchronous>, transform_indices = @transform_1, window_bounds = array<i64: 8, 1>}, {pipeline_mode = #tpu.pipeline_mode<synchronous>, transform_indices = @transform_2, window_bounds = array<i64: 1, 8>}, {pipeline_mode = #tpu.pipeline_mode<synchronous>, transform_indices = @transform_3, window_bounds = array<i64: 1, 1>}, {pipeline_mode = #tpu.pipeline_mode<synchronous>, transform_indices = @transform_4, window_bounds = array<i64: 1, 1>}]} {
    %0 = tpu.iota {dimensions = array<i32: 0>} : vector<8x1xi32>
    %1 = tpu.iota {dimensions = array<i32: 1>} : vector<1x8xi32>
    %c0_i32 = arith.constant 0 : i32
    %2 = arith.cmpi eq, %arg0, %c0_i32 : i32
    %3 = arith.extui %2 : i1 to i32
    %c0_i32_0 = arith.constant 0 : i32
    %4 = arith.cmpi ne, %3, %c0_i32_0 : i32
    scf.if %4 {
      %cst_85 = arith.constant 0.000000e+00 : f32
      %257 = vector.broadcast %cst_85 : f32 to vector<1x1xf32>
      %c0_86 = arith.constant 0 : index
      %c0_87 = arith.constant 0 : index
      %258 = vector.load %arg5[%c0_86, %c0_87] : memref<1x1xf32, #tpu.memory_space<vmem>>, vector<1x1xf32>
      tpu.vector_store %arg5[%c0_86, %c0_87], %257 {strides = array<i32>} : memref<1x1xf32, #tpu.memory_space<vmem>>, vector<1x1xf32>,
      %cst_88 = arith.constant 0.000000e+00 : f32
      %259 = vector.broadcast %cst_88 : f32 to vector<1x1xf32>
      %c0_89 = arith.constant 0 : index
      %c0_90 = arith.constant 0 : index
      %260 = vector.load %arg6[%c0_89, %c0_90] : memref<1x1xf32, #tpu.memory_space<vmem>>, vector<1x1xf32>
      tpu.vector_store %arg6[%c0_89, %c0_90], %259 {strides = array<i32>} : memref<1x1xf32, #tpu.memory_space<vmem>>, vector<1x1xf32>,
      "tpu.region"() ({
        %alloca = memref.alloca() : memref<8x32xf32, #tpu.memory_space<vmem>>
        %261 = tpu.sem_alloc : memref<!tpu.dma_semaphore, #tpu.memory_space<semaphore_mem>>
        tpu.enqueue_dma source(%arg2 : memref<8x32xf32, #tpu.memory_space<any>>) target(%alloca : memref<8x32xf32, #tpu.memory_space<vmem>>) target_semaphore(%261 : memref<!tpu.dma_semaphore, #tpu.memory_space<semaphore_mem>>)
        tpu.wait_dma2 semaphore(%261 : memref<!tpu.dma_semaphore, #tpu.memory_space<semaphore_mem>>) src(%arg2 : memref<8x32xf32, #tpu.memory_space<any>>) dst(%alloca : memref<8x32xf32, #tpu.memory_space<vmem>>)
        %c0_91 = arith.constant 0 : index
        %c0_92 = arith.constant 0 : index
        %262 = vector.load %alloca[%c0_91, %c0_92] : memref<8x32xf32, #tpu.memory_space<vmem>>, vector<8x32xf32>
        %263 = arith.mulf %262, %262 : vector<8x32xf32>
        %cst_93 = arith.constant dense<0.000000e+00> : vector<8xf32>
        %264 = vector.multi_reduction <add>, %263, %cst_93 [1] : vector<8x32xf32> to vector<8xf32>
        %265 = vector.shape_cast %264 : vector<8xf32> to vector<8x1xf32>
        %cst_94 = arith.constant 1.000000e+00 : f32
        %266 = vector.broadcast %cst_94 : f32 to vector<1x32xf32>
        %cst_95 = arith.constant dense<0.000000e+00> : vector<1x8xf32>
        %267 = tpu.matmul %266, %263, %cst_95 {dimension_numbers = #tpu.dot_dimension_numbers<[1], [1], [0], [0], [0, 0, 1, 0], [], []>} : vector<1x32xf32>, vector<8x32xf32>, vector<1x8xf32> -> vector<1x8xf32>
        %cst_96 = arith.constant dense<0.000000e+00> : vector<8x8xf32>
        %268 = tpu.matmul %262, %262, %cst_96 {dimension_numbers = #tpu.dot_dimension_numbers<[1], [1], [0], [0], [0, 0, 1, 0], [], []>} : vector<8x32xf32>, vector<8x32xf32>, vector<8x8xf32> -> vector<8x8xf32>
        %cst_97 = arith.constant 2.000000e+00 : f32
        %269 = vector.broadcast %cst_97 : f32 to vector<8x8xf32>
        %270 = arith.mulf %269, %268 : vector<8x8xf32>
        %271 = vector.broadcast %267 : vector<1x8xf32> to vector<8x8xf32>
        %272 = arith.subf %271, %270 : vector<8x8xf32>
        %273 = vector.broadcast %265 : vector<8x1xf32> to vector<8x8xf32>
        %274 = arith.addf %272, %273 : vector<8x8xf32>
        %cst_98 = arith.constant 0.000000e+00 : f32
        %275 = vector.broadcast %cst_98 : f32 to vector<8x8xf32>
        %276 = arith.maximumf %274, %275 : vector<8x8xf32>
        %cst_99 = arith.constant 0.000000e+00 : f32
        %277 = vector.broadcast %cst_99 : f32 to vector<8x8xf32>
        %278 = arith.cmpf oeq, %276, %277 : vector<8x8xf32>
        %279 = arith.extui %278 : vector<8x8xi1> to vector<8x8xi32>
        %280 = arith.sitofp %279 : vector<8x8xi32> to vector<8x8xf32>
        %cst_100 = arith.constant 9.99999993E-9 : f32
        %281 = vector.broadcast %cst_100 : f32 to vector<8x8xf32>
        %282 = arith.mulf %280, %281 : vector<8x8xf32>
        %283 = arith.addf %276, %282 : vector<8x8xf32>
        %284 = math.sqrt %283 : vector<8x8xf32>
        %cst_101 = arith.constant 1.000000e+00 : f32
        %285 = vector.broadcast %cst_101 : f32 to vector<8x8xf32>
        %286 = arith.subf %285, %280 : vector<8x8xf32>
        %287 = arith.mulf %284, %286 : vector<8x8xf32>
        %c0_102 = arith.constant 0 : index
        %c0_103 = arith.constant 0 : index
        %288 = vector.load %arg7[%c0_102, %c0_103] : memref<8x8xf32, #tpu.memory_space<vmem>>, vector<8x8xf32>
        tpu.vector_store %arg7[%c0_102, %c0_103], %287 {strides = array<i32>} : memref<8x8xf32, #tpu.memory_space<vmem>>, vector<8x8xf32>,
        tpu.yield
      }) : () -> ()
    } else {
    }
    %c0 = arith.constant 0 : index
    %c0_1 = arith.constant 0 : index
    %5 = vector.load %arg3[%c0, %c0_1] : memref<8x1xi32, #tpu.memory_space<vmem>>, vector<8x1xi32>
    %c0_2 = arith.constant 0 : index
    %c0_3 = arith.constant 0 : index
    %6 = vector.load %arg4[%c0_2, %c0_3] : memref<1x8xi32, #tpu.memory_space<vmem>>, vector<1x8xi32>
    %7 = vector.broadcast %0 : vector<8x1xi32> to vector<8x8xi32>
    %8 = vector.broadcast %1 : vector<1x8xi32> to vector<8x8xi32>
    %9 = arith.cmpi ne, %7, %8 : vector<8x8xi32>
    %10 = vector.broadcast %5 : vector<8x1xi32> to vector<8x8xi32>
    %11 = vector.broadcast %6 : vector<1x8xi32> to vector<8x8xi32>
    %12 = arith.cmpi ne, %10, %11 : vector<8x8xi32>
    %13 = arith.andi %9, %12 : vector<8x8xi1>
    %c0_4 = arith.constant 0 : index
    %c0_5 = arith.constant 0 : index
    %14 = vector.load %arg7[%c0_4, %c0_5] : memref<8x8xf32, #tpu.memory_space<vmem>>, vector<8x8xf32>
    %cst = arith.constant 1.000000e+00 : f32
    %15 = vector.broadcast %cst : f32 to vector<8x8xf32>
    %16 = arith.subf %15, %14 : vector<8x8xf32>
    %cst_6 = arith.constant 0xFF800000 : f32
    %17 = vector.broadcast %cst_6 : f32 to vector<8x8xf32>
    %18 = arith.select %13, %16, %17 : vector<8x8xi1>, vector<8x8xf32>
    %c8_i32 = arith.constant 8 : i32
    %19 = arith.muli %arg0, %c8_i32 : i32
    %20 = tpu.assume_multiple %19, 8 : i32
    %cst_7 = arith.constant 1.000000e+00 : f32
    %21 = vector.broadcast %cst_7 : f32 to vector<8x1xf32>
    %cst_8 = arith.constant 0.000000e+00 : f32
    %22 = vector.broadcast %cst_8 : f32 to vector<8x1xf32>
    %c0_i32_9 = arith.constant 0 : i32
    %23 = arith.addi %20, %c0_i32_9 : i32
    %c8_i32_10 = arith.constant 8 : i32
    %24 = arith.cmpi slt, %23, %c8_i32_10 : i32
    %c0_i32_11 = arith.constant 0 : i32
    %25 = arith.select %24, %23, %c0_i32_11 : i32
    %26 = arith.index_cast %25 : i32 to index
    %27 = memref.load %arg1[%26] : memref<8xi32, #tpu.memory_space<smem>>
    %28 = arith.index_cast %25 : i32 to index
    %c0_12 = arith.constant 0 : index
    %29 = vector.load %arg7[%28, %c0_12] : memref<8x8xf32, #tpu.memory_space<vmem>>, vector<1x8xf32>
    %30 = vector.broadcast %23 : i32 to vector<1x8xi32>
    %31 = arith.cmpi ne, %1, %30 : vector<1x8xi32>
    %32 = vector.broadcast %27 : i32 to vector<1x8xi32>
    %33 = arith.cmpi eq, %6, %32 : vector<1x8xi32>
    %34 = arith.andi %31, %33 : vector<1x8xi1>
    %35 = vector.broadcast %24 : i1 to vector<1x8xi1>
    %36 = arith.andi %34, %35 : vector<1x8xi1>
    %cst_13 = arith.constant 0xFF800000 : f32
    %37 = vector.broadcast %cst_13 : f32 to vector<1x8xf32>
    %38 = arith.select %36, %29, %37 : vector<1x8xi1>, vector<1x8xf32>
    %39 = vector.broadcast %38 : vector<1x8xf32> to vector<8x8xf32>
    %40 = arith.addf %39, %18 : vector<8x8xf32>
    %cst_14 = arith.constant 0.000000e+00 : f32
    %41 = vector.broadcast %cst_14 : f32 to vector<8x8xf32>
    %42 = arith.maximumf %40, %41 : vector<8x8xf32>
    %cst_15 = arith.constant 9.99999993E-9 : f32
    %43 = vector.broadcast %cst_15 : f32 to vector<8x8xf32>
    %44 = arith.cmpf ogt, %42, %43 : vector<8x8xf32>
    %45 = arith.extui %44 : vector<8x8xi1> to vector<8x8xi32>
    %46 = arith.sitofp %45 : vector<8x8xi32> to vector<8x8xf32>
    %cst_16 = arith.constant dense<0.000000e+00> : vector<8x1xf32>
    %47 = tpu.matmul %42, %21, %cst_16 {dimension_numbers = #tpu.dot_dimension_numbers<[1], [0], [0], [1], [0, 0, 1, 1], [], []>} : vector<8x8xf32>, vector<8x1xf32>, vector<8x1xf32> -> vector<8x1xf32>
    %48 = arith.addf %22, %47 : vector<8x1xf32>
    %cst_17 = arith.constant dense<0.000000e+00> : vector<8x1xf32>
    %49 = tpu.matmul %46, %21, %cst_17 {dimension_numbers = #tpu.dot_dimension_numbers<[1], [0], [0], [1], [0, 0, 1, 1], [], []>} : vector<8x8xf32>, vector<8x1xf32>, vector<8x1xf32> -> vector<8x1xf32>
    %50 = arith.addf %22, %49 : vector<8x1xf32>
    %c1_i32 = arith.constant 1 : i32
    %51 = arith.addi %20, %c1_i32 : i32
    %c8_i32_18 = arith.constant 8 : i32
    %52 = arith.cmpi slt, %51, %c8_i32_18 : i32
    %c0_i32_19 = arith.constant 0 : i32
    %53 = arith.select %52, %51, %c0_i32_19 : i32
    %54 = arith.index_cast %53 : i32 to index
    %55 = memref.load %arg1[%54] : memref<8xi32, #tpu.memory_space<smem>>
    %56 = arith.index_cast %53 : i32 to index
    %c0_20 = arith.constant 0 : index
    %57 = vector.load %arg7[%56, %c0_20] : memref<8x8xf32, #tpu.memory_space<vmem>>, vector<1x8xf32>
    %58 = vector.broadcast %51 : i32 to vector<1x8xi32>
    %59 = arith.cmpi ne, %1, %58 : vector<1x8xi32>
    %60 = vector.broadcast %55 : i32 to vector<1x8xi32>
    %61 = arith.cmpi eq, %6, %60 : vector<1x8xi32>
    %62 = arith.andi %59, %61 : vector<1x8xi1>
    %63 = vector.broadcast %52 : i1 to vector<1x8xi1>
    %64 = arith.andi %62, %63 : vector<1x8xi1>
    %cst_21 = arith.constant 0xFF800000 : f32
    %65 = vector.broadcast %cst_21 : f32 to vector<1x8xf32>
    %66 = arith.select %64, %57, %65 : vector<1x8xi1>, vector<1x8xf32>
    %67 = vector.broadcast %66 : vector<1x8xf32> to vector<8x8xf32>
    %68 = arith.addf %67, %18 : vector<8x8xf32>
    %cst_22 = arith.constant 0.000000e+00 : f32
    %69 = vector.broadcast %cst_22 : f32 to vector<8x8xf32>
    %70 = arith.maximumf %68, %69 : vector<8x8xf32>
    %cst_23 = arith.constant 9.99999993E-9 : f32
    %71 = vector.broadcast %cst_23 : f32 to vector<8x8xf32>
    %72 = arith.cmpf ogt, %70, %71 : vector<8x8xf32>
    %73 = arith.extui %72 : vector<8x8xi1> to vector<8x8xi32>
    %74 = arith.sitofp %73 : vector<8x8xi32> to vector<8x8xf32>
    %cst_24 = arith.constant dense<0.000000e+00> : vector<8x1xf32>
    %75 = tpu.matmul %70, %21, %cst_24 {dimension_numbers = #tpu.dot_dimension_numbers<[1], [0], [0], [1], [0, 0, 1, 1], [], []>} : vector<8x8xf32>, vector<8x1xf32>, vector<8x1xf32> -> vector<8x1xf32>
    %76 = arith.addf %48, %75 : vector<8x1xf32>
    %cst_25 = arith.constant dense<0.000000e+00> : vector<8x1xf32>
    %77 = tpu.matmul %74, %21, %cst_25 {dimension_numbers = #tpu.dot_dimension_numbers<[1], [0], [0], [1], [0, 0, 1, 1], [], []>} : vector<8x8xf32>, vector<8x1xf32>, vector<8x1xf32> -> vector<8x1xf32>
    %78 = arith.addf %50, %77 : vector<8x1xf32>
    %c2_i32 = arith.constant 2 : i32
    %79 = arith.addi %20, %c2_i32 : i32
    %c8_i32_26 = arith.constant 8 : i32
    %80 = arith.cmpi slt, %79, %c8_i32_26 : i32
    %c0_i32_27 = arith.constant 0 : i32
    %81 = arith.select %80, %79, %c0_i32_27 : i32
    %82 = arith.index_cast %81 : i32 to index
    %83 = memref.load %arg1[%82] : memref<8xi32, #tpu.memory_space<smem>>
    %84 = arith.index_cast %81 : i32 to index
    %c0_28 = arith.constant 0 : index
    %85 = vector.load %arg7[%84, %c0_28] : memref<8x8xf32, #tpu.memory_space<vmem>>, vector<1x8xf32>
    %86 = vector.broadcast %79 : i32 to vector<1x8xi32>
    %87 = arith.cmpi ne, %1, %86 : vector<1x8xi32>
    %88 = vector.broadcast %83 : i32 to vector<1x8xi32>
    %89 = arith.cmpi eq, %6, %88 : vector<1x8xi32>
    %90 = arith.andi %87, %89 : vector<1x8xi1>
    %91 = vector.broadcast %80 : i1 to vector<1x8xi1>
    %92 = arith.andi %90, %91 : vector<1x8xi1>
    %cst_29 = arith.constant 0xFF800000 : f32
    %93 = vector.broadcast %cst_29 : f32 to vector<1x8xf32>
    %94 = arith.select %92, %85, %93 : vector<1x8xi1>, vector<1x8xf32>
    %95 = vector.broadcast %94 : vector<1x8xf32> to vector<8x8xf32>
    %96 = arith.addf %95, %18 : vector<8x8xf32>
    %cst_30 = arith.constant 0.000000e+00 : f32
    %97 = vector.broadcast %cst_30 : f32 to vector<8x8xf32>
    %98 = arith.maximumf %96, %97 : vector<8x8xf32>
    %cst_31 = arith.constant 9.99999993E-9 : f32
    %99 = vector.broadcast %cst_31 : f32 to vector<8x8xf32>
    %100 = arith.cmpf ogt, %98, %99 : vector<8x8xf32>
    %101 = arith.extui %100 : vector<8x8xi1> to vector<8x8xi32>
    %102 = arith.sitofp %101 : vector<8x8xi32> to vector<8x8xf32>
    %cst_32 = arith.constant dense<0.000000e+00> : vector<8x1xf32>
    %103 = tpu.matmul %98, %21, %cst_32 {dimension_numbers = #tpu.dot_dimension_numbers<[1], [0], [0], [1], [0, 0, 1, 1], [], []>} : vector<8x8xf32>, vector<8x1xf32>, vector<8x1xf32> -> vector<8x1xf32>
    %104 = arith.addf %76, %103 : vector<8x1xf32>
    %cst_33 = arith.constant dense<0.000000e+00> : vector<8x1xf32>
    %105 = tpu.matmul %102, %21, %cst_33 {dimension_numbers = #tpu.dot_dimension_numbers<[1], [0], [0], [1], [0, 0, 1, 1], [], []>} : vector<8x8xf32>, vector<8x1xf32>, vector<8x1xf32> -> vector<8x1xf32>
    %106 = arith.addf %78, %105 : vector<8x1xf32>
    %c3_i32 = arith.constant 3 : i32
    %107 = arith.addi %20, %c3_i32 : i32
    %c8_i32_34 = arith.constant 8 : i32
    %108 = arith.cmpi slt, %107, %c8_i32_34 : i32
    %c0_i32_35 = arith.constant 0 : i32
    %109 = arith.select %108, %107, %c0_i32_35 : i32
    %110 = arith.index_cast %109 : i32 to index
    %111 = memref.load %arg1[%110] : memref<8xi32, #tpu.memory_space<smem>>
    %112 = arith.index_cast %109 : i32 to index
    %c0_36 = arith.constant 0 : index
    %113 = vector.load %arg7[%112, %c0_36] : memref<8x8xf32, #tpu.memory_space<vmem>>, vector<1x8xf32>
    %114 = vector.broadcast %107 : i32 to vector<1x8xi32>
    %115 = arith.cmpi ne, %1, %114 : vector<1x8xi32>
    %116 = vector.broadcast %111 : i32 to vector<1x8xi32>
    %117 = arith.cmpi eq, %6, %116 : vector<1x8xi32>
    %118 = arith.andi %115, %117 : vector<1x8xi1>
    %119 = vector.broadcast %108 : i1 to vector<1x8xi1>
    %120 = arith.andi %118, %119 : vector<1x8xi1>
    %cst_37 = arith.constant 0xFF800000 : f32
    %121 = vector.broadcast %cst_37 : f32 to vector<1x8xf32>
    %122 = arith.select %120, %113, %121 : vector<1x8xi1>, vector<1x8xf32>
    %123 = vector.broadcast %122 : vector<1x8xf32> to vector<8x8xf32>
    %124 = arith.addf %123, %18 : vector<8x8xf32>
    %cst_38 = arith.constant 0.000000e+00 : f32
    %125 = vector.broadcast %cst_38 : f32 to vector<8x8xf32>
    %126 = arith.maximumf %124, %125 : vector<8x8xf32>
    %cst_39 = arith.constant 9.99999993E-9 : f32
    %127 = vector.broadcast %cst_39 : f32 to vector<8x8xf32>
    %128 = arith.cmpf ogt, %126, %127 : vector<8x8xf32>
    %129 = arith.extui %128 : vector<8x8xi1> to vector<8x8xi32>
    %130 = arith.sitofp %129 : vector<8x8xi32> to vector<8x8xf32>
    %cst_40 = arith.constant dense<0.000000e+00> : vector<8x1xf32>
    %131 = tpu.matmul %126, %21, %cst_40 {dimension_numbers = #tpu.dot_dimension_numbers<[1], [0], [0], [1], [0, 0, 1, 1], [], []>} : vector<8x8xf32>, vector<8x1xf32>, vector<8x1xf32> -> vector<8x1xf32>
    %132 = arith.addf %104, %131 : vector<8x1xf32>
    %cst_41 = arith.constant dense<0.000000e+00> : vector<8x1xf32>
    %133 = tpu.matmul %130, %21, %cst_41 {dimension_numbers = #tpu.dot_dimension_numbers<[1], [0], [0], [1], [0, 0, 1, 1], [], []>} : vector<8x8xf32>, vector<8x1xf32>, vector<8x1xf32> -> vector<8x1xf32>
    %134 = arith.addf %106, %133 : vector<8x1xf32>
    %c4_i32 = arith.constant 4 : i32
    %135 = arith.addi %20, %c4_i32 : i32
    %c8_i32_42 = arith.constant 8 : i32
    %136 = arith.cmpi slt, %135, %c8_i32_42 : i32
    %c0_i32_43 = arith.constant 0 : i32
    %137 = arith.select %136, %135, %c0_i32_43 : i32
    %138 = arith.index_cast %137 : i32 to index
    %139 = memref.load %arg1[%138] : memref<8xi32, #tpu.memory_space<smem>>
    %140 = arith.index_cast %137 : i32 to index
    %c0_44 = arith.constant 0 : index
    %141 = vector.load %arg7[%140, %c0_44] : memref<8x8xf32, #tpu.memory_space<vmem>>, vector<1x8xf32>
    %142 = vector.broadcast %135 : i32 to vector<1x8xi32>
    %143 = arith.cmpi ne, %1, %142 : vector<1x8xi32>
    %144 = vector.broadcast %139 : i32 to vector<1x8xi32>
    %145 = arith.cmpi eq, %6, %144 : vector<1x8xi32>
    %146 = arith.andi %143, %145 : vector<1x8xi1>
    %147 = vector.broadcast %136 : i1 to vector<1x8xi1>
    %148 = arith.andi %146, %147 : vector<1x8xi1>
    %cst_45 = arith.constant 0xFF800000 : f32
    %149 = vector.broadcast %cst_45 : f32 to vector<1x8xf32>
    %150 = arith.select %148, %141, %149 : vector<1x8xi1>, vector<1x8xf32>
    %151 = vector.broadcast %150 : vector<1x8xf32> to vector<8x8xf32>
    %152 = arith.addf %151, %18 : vector<8x8xf32>
    %cst_46 = arith.constant 0.000000e+00 : f32
    %153 = vector.broadcast %cst_46 : f32 to vector<8x8xf32>
    %154 = arith.maximumf %152, %153 : vector<8x8xf32>
    %cst_47 = arith.constant 9.99999993E-9 : f32
    %155 = vector.broadcast %cst_47 : f32 to vector<8x8xf32>
    %156 = arith.cmpf ogt, %154, %155 : vector<8x8xf32>
    %157 = arith.extui %156 : vector<8x8xi1> to vector<8x8xi32>
    %158 = arith.sitofp %157 : vector<8x8xi32> to vector<8x8xf32>
    %cst_48 = arith.constant dense<0.000000e+00> : vector<8x1xf32>
    %159 = tpu.matmul %154, %21, %cst_48 {dimension_numbers = #tpu.dot_dimension_numbers<[1], [0], [0], [1], [0, 0, 1, 1], [], []>} : vector<8x8xf32>, vector<8x1xf32>, vector<8x1xf32> -> vector<8x1xf32>
    %160 = arith.addf %132, %159 : vector<8x1xf32>
    %cst_49 = arith.constant dense<0.000000e+00> : vector<8x1xf32>
    %161 = tpu.matmul %158, %21, %cst_49 {dimension_numbers = #tpu.dot_dimension_numbers<[1], [0], [0], [1], [0, 0, 1, 1], [], []>} : vector<8x8xf32>, vector<8x1xf32>, vector<8x1xf32> -> vector<8x1xf32>
    %162 = arith.addf %134, %161 : vector<8x1xf32>
    %c5_i32 = arith.constant 5 : i32
    %163 = arith.addi %20, %c5_i32 : i32
    %c8_i32_50 = arith.constant 8 : i32
    %164 = arith.cmpi slt, %163, %c8_i32_50 : i32
    %c0_i32_51 = arith.constant 0 : i32
    %165 = arith.select %164, %163, %c0_i32_51 : i32
    %166 = arith.index_cast %165 : i32 to index
    %167 = memref.load %arg1[%166] : memref<8xi32, #tpu.memory_space<smem>>
    %168 = arith.index_cast %165 : i32 to index
    %c0_52 = arith.constant 0 : index
    %169 = vector.load %arg7[%168, %c0_52] : memref<8x8xf32, #tpu.memory_space<vmem>>, vector<1x8xf32>
    %170 = vector.broadcast %163 : i32 to vector<1x8xi32>
    %171 = arith.cmpi ne, %1, %170 : vector<1x8xi32>
    %172 = vector.broadcast %167 : i32 to vector<1x8xi32>
    %173 = arith.cmpi eq, %6, %172 : vector<1x8xi32>
    %174 = arith.andi %171, %173 : vector<1x8xi1>
    %175 = vector.broadcast %164 : i1 to vector<1x8xi1>
    %176 = arith.andi %174, %175 : vector<1x8xi1>
    %cst_53 = arith.constant 0xFF800000 : f32
    %177 = vector.broadcast %cst_53 : f32 to vector<1x8xf32>
    %178 = arith.select %176, %169, %177 : vector<1x8xi1>, vector<1x8xf32>
    %179 = vector.broadcast %178 : vector<1x8xf32> to vector<8x8xf32>
    %180 = arith.addf %179, %18 : vector<8x8xf32>
    %cst_54 = arith.constant 0.000000e+00 : f32
    %181 = vector.broadcast %cst_54 : f32 to vector<8x8xf32>
    %182 = arith.maximumf %180, %181 : vector<8x8xf32>
    %cst_55 = arith.constant 9.99999993E-9 : f32
    %183 = vector.broadcast %cst_55 : f32 to vector<8x8xf32>
    %184 = arith.cmpf ogt, %182, %183 : vector<8x8xf32>
    %185 = arith.extui %184 : vector<8x8xi1> to vector<8x8xi32>
    %186 = arith.sitofp %185 : vector<8x8xi32> to vector<8x8xf32>
    %cst_56 = arith.constant dense<0.000000e+00> : vector<8x1xf32>
    %187 = tpu.matmul %182, %21, %cst_56 {dimension_numbers = #tpu.dot_dimension_numbers<[1], [0], [0], [1], [0, 0, 1, 1], [], []>} : vector<8x8xf32>, vector<8x1xf32>, vector<8x1xf32> -> vector<8x1xf32>
    %188 = arith.addf %160, %187 : vector<8x1xf32>
    %cst_57 = arith.constant dense<0.000000e+00> : vector<8x1xf32>
    %189 = tpu.matmul %186, %21, %cst_57 {dimension_numbers = #tpu.dot_dimension_numbers<[1], [0], [0], [1], [0, 0, 1, 1], [], []>} : vector<8x8xf32>, vector<8x1xf32>, vector<8x1xf32> -> vector<8x1xf32>
    %190 = arith.addf %162, %189 : vector<8x1xf32>
    %c6_i32 = arith.constant 6 : i32
    %191 = arith.addi %20, %c6_i32 : i32
    %c8_i32_58 = arith.constant 8 : i32
    %192 = arith.cmpi slt, %191, %c8_i32_58 : i32
    %c0_i32_59 = arith.constant 0 : i32
    %193 = arith.select %192, %191, %c0_i32_59 : i32
    %194 = arith.index_cast %193 : i32 to index
    %195 = memref.load %arg1[%194] : memref<8xi32, #tpu.memory_space<smem>>
    %196 = arith.index_cast %193 : i32 to index
    %c0_60 = arith.constant 0 : index
    %197 = vector.load %arg7[%196, %c0_60] : memref<8x8xf32, #tpu.memory_space<vmem>>, vector<1x8xf32>
    %198 = vector.broadcast %191 : i32 to vector<1x8xi32>
    %199 = arith.cmpi ne, %1, %198 : vector<1x8xi32>
    %200 = vector.broadcast %195 : i32 to vector<1x8xi32>
    %201 = arith.cmpi eq, %6, %200 : vector<1x8xi32>
    %202 = arith.andi %199, %201 : vector<1x8xi1>
    %203 = vector.broadcast %192 : i1 to vector<1x8xi1>
    %204 = arith.andi %202, %203 : vector<1x8xi1>
    %cst_61 = arith.constant 0xFF800000 : f32
    %205 = vector.broadcast %cst_61 : f32 to vector<1x8xf32>
    %206 = arith.select %204, %197, %205 : vector<1x8xi1>, vector<1x8xf32>
    %207 = vector.broadcast %206 : vector<1x8xf32> to vector<8x8xf32>
    %208 = arith.addf %207, %18 : vector<8x8xf32>
    %cst_62 = arith.constant 0.000000e+00 : f32
    %209 = vector.broadcast %cst_62 : f32 to vector<8x8xf32>
    %210 = arith.maximumf %208, %209 : vector<8x8xf32>
    %cst_63 = arith.constant 9.99999993E-9 : f32
    %211 = vector.broadcast %cst_63 : f32 to vector<8x8xf32>
    %212 = arith.cmpf ogt, %210, %211 : vector<8x8xf32>
    %213 = arith.extui %212 : vector<8x8xi1> to vector<8x8xi32>
    %214 = arith.sitofp %213 : vector<8x8xi32> to vector<8x8xf32>
    %cst_64 = arith.constant dense<0.000000e+00> : vector<8x1xf32>
    %215 = tpu.matmul %210, %21, %cst_64 {dimension_numbers = #tpu.dot_dimension_numbers<[1], [0], [0], [1], [0, 0, 1, 1], [], []>} : vector<8x8xf32>, vector<8x1xf32>, vector<8x1xf32> -> vector<8x1xf32>
    %216 = arith.addf %188, %215 : vector<8x1xf32>
    %cst_65 = arith.constant dense<0.000000e+00> : vector<8x1xf32>
    %217 = tpu.matmul %214, %21, %cst_65 {dimension_numbers = #tpu.dot_dimension_numbers<[1], [0], [0], [1], [0, 0, 1, 1], [], []>} : vector<8x8xf32>, vector<8x1xf32>, vector<8x1xf32> -> vector<8x1xf32>
    %218 = arith.addf %190, %217 : vector<8x1xf32>
    %c7_i32 = arith.constant 7 : i32
    %219 = arith.addi %20, %c7_i32 : i32
    %c8_i32_66 = arith.constant 8 : i32
    %220 = arith.cmpi slt, %219, %c8_i32_66 : i32
    %c0_i32_67 = arith.constant 0 : i32
    %221 = arith.select %220, %219, %c0_i32_67 : i32
    %222 = arith.index_cast %221 : i32 to index
    %223 = memref.load %arg1[%222] : memref<8xi32, #tpu.memory_space<smem>>
    %224 = arith.index_cast %221 : i32 to index
    %c0_68 = arith.constant 0 : index
    %225 = vector.load %arg7[%224, %c0_68] : memref<8x8xf32, #tpu.memory_space<vmem>>, vector<1x8xf32>
    %226 = vector.broadcast %219 : i32 to vector<1x8xi32>
    %227 = arith.cmpi ne, %1, %226 : vector<1x8xi32>
    %228 = vector.broadcast %223 : i32 to vector<1x8xi32>
    %229 = arith.cmpi eq, %6, %228 : vector<1x8xi32>
    %230 = arith.andi %227, %229 : vector<1x8xi1>
    %231 = vector.broadcast %220 : i1 to vector<1x8xi1>
    %232 = arith.andi %230, %231 : vector<1x8xi1>
    %cst_69 = arith.constant 0xFF800000 : f32
    %233 = vector.broadcast %cst_69 : f32 to vector<1x8xf32>
    %234 = arith.select %232, %225, %233 : vector<1x8xi1>, vector<1x8xf32>
    %235 = vector.broadcast %234 : vector<1x8xf32> to vector<8x8xf32>
    %236 = arith.addf %235, %18 : vector<8x8xf32>
    %cst_70 = arith.constant 0.000000e+00 : f32
    %237 = vector.broadcast %cst_70 : f32 to vector<8x8xf32>
    %238 = arith.maximumf %236, %237 : vector<8x8xf32>
    %cst_71 = arith.constant 9.99999993E-9 : f32
    %239 = vector.broadcast %cst_71 : f32 to vector<8x8xf32>
    %240 = arith.cmpf ogt, %238, %239 : vector<8x8xf32>
    %241 = arith.extui %240 : vector<8x8xi1> to vector<8x8xi32>
    %242 = arith.sitofp %241 : vector<8x8xi32> to vector<8x8xf32>
    %cst_72 = arith.constant dense<0.000000e+00> : vector<8x1xf32>
    %243 = tpu.matmul %238, %21, %cst_72 {dimension_numbers = #tpu.dot_dimension_numbers<[1], [0], [0], [1], [0, 0, 1, 1], [], []>} : vector<8x8xf32>, vector<8x1xf32>, vector<8x1xf32> -> vector<8x1xf32>
    %244 = arith.addf %216, %243 : vector<8x1xf32>
    %cst_73 = arith.constant dense<0.000000e+00> : vector<8x1xf32>
    %245 = tpu.matmul %242, %21, %cst_73 {dimension_numbers = #tpu.dot_dimension_numbers<[1], [0], [0], [1], [0, 0, 1, 1], [], []>} : vector<8x8xf32>, vector<8x1xf32>, vector<8x1xf32> -> vector<8x1xf32>
    %246 = arith.addf %218, %245 : vector<8x1xf32>
    %c8_i32_74 = arith.constant 8 : i32
    %c0_75 = arith.constant 0 : index
    %c0_76 = arith.constant 0 : index
    %247 = vector.load %arg5[%c0_75, %c0_76] : memref<1x1xf32, #tpu.memory_space<vmem>>, vector<1x1xf32>
    %cst_77 = arith.constant dense<0.000000e+00> : vector<1xf32>
    %248 = vector.multi_reduction <add>, %244, %cst_77 [0] : vector<8x1xf32> to vector<1xf32>
    %249 = vector.shape_cast %248 : vector<1xf32> to vector<1x1xf32>
    %250 = arith.addf %247, %249 : vector<1x1xf32>
    %c0_78 = arith.constant 0 : index
    %c0_79 = arith.constant 0 : index
    %251 = vector.load %arg5[%c0_78, %c0_79] : memref<1x1xf32, #tpu.memory_space<vmem>>, vector<1x1xf32>
    tpu.vector_store %arg5[%c0_78, %c0_79], %250 {strides = array<i32>} : memref<1x1xf32, #tpu.memory_space<vmem>>, vector<1x1xf32>,
    %c0_80 = arith.constant 0 : index
    %c0_81 = arith.constant 0 : index
    %252 = vector.load %arg6[%c0_80, %c0_81] : memref<1x1xf32, #tpu.memory_space<vmem>>, vector<1x1xf32>
    %cst_82 = arith.constant dense<0.000000e+00> : vector<1xf32>
    %253 = vector.multi_reduction <add>, %246, %cst_82 [0] : vector<8x1xf32> to vector<1xf32>
    %254 = vector.shape_cast %253 : vector<1xf32> to vector<1x1xf32>
    %255 = arith.addf %252, %254 : vector<1x1xf32>
    %c0_83 = arith.constant 0 : index
    %c0_84 = arith.constant 0 : index
    %256 = vector.load %arg6[%c0_83, %c0_84] : memref<1x1xf32, #tpu.memory_space<vmem>>, vector<1x1xf32>
    tpu.vector_store %arg6[%c0_83, %c0_84], %255 {strides = array<i32>} : memref<1x1xf32, #tpu.memory_space<vmem>>, vector<1x1xf32>,
    return
  }
  func.func @transform_1(%arg0: i32, %arg1: memref<8xi32, #tpu.memory_space<smem>>) -> (i32, i32) {
    %c0_i32 = arith.constant 0 : i32
    %c0_i32_0 = arith.constant 0 : i32
    %c0_i32_1 = arith.constant 0 : i32
    return %c0_i32, %c0_i32_0 : i32, i32
  }
  func.func @transform_2(%arg0: i32, %arg1: memref<8xi32, #tpu.memory_space<smem>>) -> (i32, i32) {
    %c0_i32 = arith.constant 0 : i32
    %c0_i32_0 = arith.constant 0 : i32
    %c0_i32_1 = arith.constant 0 : i32
    return %c0_i32, %c0_i32_0 : i32, i32
  }
  func.func @transform_3(%arg0: i32, %arg1: memref<8xi32, #tpu.memory_space<smem>>) -> (i32, i32) {
    %c0_i32 = arith.constant 0 : i32
    %c0_i32_0 = arith.constant 0 : i32
    %c0_i32_1 = arith.constant 0 : i32
    return %c0_i32, %c0_i32_0 : i32, i32
  }
  func.func @transform_4(%arg0: i32, %arg1: memref<8xi32, #tpu.memory_space<smem>>) -> (i32, i32) {
    %c0_i32 = arith.constant 0 : i32
    %c0_i32_0 = arith.constant 0 : i32
    %c0_i32_1 = arith.constant 0 : i32
    return %c0_i32, %c0_i32_0 : i32, i32
  }
}

</mosaic_0001>

<bundles_post_ra>
// kernel: tpu_custom_call.1
= control target key start
LH: loop header
LB: loop body
LE: loop exit
PB: predicated region body
PF: predicated region fallthrough
CT: control target
= control target key end

     0   :  { %s905_s21 = smov [#allocation4]   ;;  %s1096_s0 = inlined_call_operand.vmem [shape: s32[8], index: 0, kind: input, shape index: {}]   ;;  %s1097_s1 = inlined_call_operand.vmem [shape: f32[8,32], index: 1, kind: input, shape index: {}]   ;;  %s1098_s2 = inlined_call_operand.vmem [shape: s32[8,1], index: 2, kind: input, shape index: {}]   ;;  %s1099_s3 = inlined_call_operand.vmem [shape: s32[1,8], index: 3, kind: input, shape index: {}]   ;;  %s1100_s4 = inlined_call_operand.hbm [shape: f32[1,1], index: 4, kind: output, shape index: {0}]   ;;  %s1101_s5 = inlined_call_operand.hbm [shape: f32[1,1], index: 5, kind: output, shape index: {1}]  }
   0x1   :  { %s12_s20 = sshll.u32 %s1096_s0, 4  ;;  %s13_s20 = int_to_ptr.vmem [resolvable:$true] %s12_s20 }
   0x2   :  { %15 = dma.vmem_to_smem %s13_s20, 16, %s905_s21, [#allocation3] }
   0x3   :  { %897 = dma.done.wait [#allocation3], 16 }
   0x4   :  { %898 = vsyncadd [#allocation3], 4294967280 }
   0x5   :  { %18 = sfence }
   0x6   :  { %19 = vsyncpa [#allocation6], 0 }
   0x7   :  { %20 = vsyncpa [#allocation8], 0  ;;  %v25_v0 = vlaneseq  ;;  %vm33_vm0 = vcmask 0   ;;  %v906_v1 = vmov 0.0  }
   0x8   :  { %34 = vst.msk [vmem:[#allocation5] sm:$0x1] %vm33_vm0, %v906_v1 }
   0x9   :  { %v948_v2 = vshrl.u32 %v25_v0, 7  ;;  %v950_v3 = vand.u32 127, %v25_v0  ;;  %35 = vst.msk [vmem:[#allocation7] sm:$0x1] %vm33_vm0, %v906_v1 }
   0xa   :  { %v62_v4 = vld [vmem:[%s1097_s1] sm:$0xff] }
   0xb   :  { %69 = vsyncadd [#allocation10], 128  ;;  %v74_v5 = vmul.f32 %v62_v4, %v62_v4  ;;  %vm75_vm1 = vcmask 261120  }
   0xc   :  { %899 = dma.done.wait [#allocation10], 128 }
   0xd   :  { %900 = vsyncadd [#allocation10], 4294967168  ;;  %791 = vmatpush.xpose.msk.msra.mxu1 %vm75_vm1, %v62_v4  ;;  %789 = vmatpush.xpose.msk.msra.mxu0 %vm75_vm1, %v74_v5  ;;  %v76_v6 = vsel %vm75_vm1, %v74_v5, 0.0  ;;  %v907_v7 = vmov 1.0   ;;  %v908_v16 = vmov 0.0   ;;  %vm152_vm5 = vcmask 64512  }
   0xe   :  { %77 = vadd.xlane.f32.xlu0 %v76_v6  ;;  %v154_v32 = vld [vmem:[%s1098_s2] sm:$0xff]  ;;  %v909_v33 = vmov 0   ;;  %v910_v34 = vmov 1.0   ;;  %s795_s2 = sld [smem:[#allocation4 + $0x1]]  ;;  %vm195_vm6 = vcmp.ne.s32.totalorder %v950_v3, 1  ;;  %vm173_vm8 = vcmp.ne.s32.totalorder %v950_v3, 0 }
   0xf   :  { %835 = vset.pattern.permute.xlu0 %v909_v33  ;;  %229 = vmatpush.msra.mxu2 %v910_v34  ;;  %s169_s24 = sld [smem:[#allocation4]]  ;;  %v972_v35 = vld [vmem:[%s1099_s3] sm:$0x1]  ;;  %vm310_vm10 = vcmp.ne.s32.totalorder %v950_v3, 2  ;;  %vm450_vm14 = vcmp.ne.s32.totalorder %v950_v3, 4  ;;  %s911_s9 = smov [#allocation5]  }
  0x10   :  { %792 = vmatmul.msk.f32.vlgmr.msra.gmra.mxu1 %vm75_vm1, %v62_v4  ;;  %790 = vmatmul.msk.f32.vlgmr.msra.gmra.mxu0 %vm75_vm1, %v907_v7  ;;  %s801_s25 = sld [smem:[#allocation4 + $0x2]]  ;;  %v836_v50 = vld [vmem:[%s1099_s3] ss:$0 sm:$0xff]  ;;  %s750_s10 = sshll.u32 %s911_s9, 4  ;;  %s751_s10 = int_to_ptr.vmem [resolvable:$true] %s750_s10 }
  0x11   :  { %252 = vmatpush.msra.mxu3 %v910_v34  ;;  %343 = vmatpush.msrb.mxu0 %v910_v34  ;;  %s809_s26 = sld [smem:[#allocation4 + $0x4]]  ;;  %s752_s13 = sshll.u32 %s1100_s4, 4  ;;  %s753_s13 = int_to_ptr.hbm [resolvable:$true] %s752_s13 }
  0x12   :  { %275 = vmatpush.msrb.mxu2 %v910_v34  ;;  %367 = vmatpush.msrb.mxu1 %v910_v34  ;;  %s805_s29 = sld [smem:[#allocation4 + $0x3]]  ;;  %s912_s14 = smov [#allocation7]  }
  0x13   :  { %298 = vmatpush.msrb.mxu3 %v910_v34  ;;  %483 = vmatpush.msra.mxu0 %v910_v34  ;;  %s978_s30 = sld [smem:[#allocation4 + $0x6]]  ;;  %s761_s15 = sshll.u32 %s912_s14, 4  ;;  %s762_s15 = int_to_ptr.vmem [resolvable:$true] %s761_s15 }
  0x14   :  { %507 = vmatpush.msra.mxu1 %v910_v34  ;;  %v196_v36 = vstv %s795_s2  ;;  %s1000_s6 = sld [smem:[#allocation4 + $0x5]]  ;;  %s763_s18 = sshll.u32 %s1101_s5, 4  ;;  %s764_s18 = int_to_ptr.hbm [resolvable:$true] %s763_s18 }
  0x15   :  { %v174_v37 = vstv %s169_s24  ;;  %vm197_vm7 = vcmp.eq.s32.totalorder %v972_v35, %v196_v36  ;;  %s1034_s3 = sld [smem:[#allocation4 + $0x7]] }
  0x16   :  { %v311_v38 = vstv %s801_s25  ;;  %vm175_vm9 = vcmp.eq.s32.totalorder %v972_v35, %v174_v37  ;;  %vm982_vm12 = vmand %vm195_vm6, %vm197_vm7  ;;  %vm156_vm6 = vcmp.ne.s32.totalorder %v948_v2, %v950_v3 }
  0x17   :  { %v451_v39 = vstv %s809_s26  ;;  %vm312_vm11 = vcmp.eq.s32.totalorder %v972_v35, %v311_v38  ;;  %vm986_vm13 = vmand %vm173_vm8, %vm175_vm9  ;;  %vm590_vm9 = vcmp.ne.s32.totalorder %v950_v3, 6 }
  0x18   :  { %vm452_vm15 = vcmp.eq.s32.totalorder %v972_v35, %v451_v39  ;;  %vm992_vm1 = vmand %vm310_vm10, %vm312_vm11  ;;  %v381_v46 = vstv %s805_s29 }
  0x19   :  { %v591_v54 = vstv %s978_s30 }
  0x1a   :  { %vm592_vm10 = vcmp.eq.s32.totalorder %v972_v35, %v591_v54 }
  0x22   :  { %158 = vperm.xlu0 %835, %v154_v32  }
  0x81   :  { %v78_v12 = vpop.xlane.xlu0 %77 }
  0x8d   :  { %v125_v8 = vpop.f32.mrf.mxu1  ;;  %v102_v9 = vpop.f32.mrf.mxu0 }
  0x8e   :  { %v128_v10 = vmul.f32 2.0, %v125_v8  ;;  %v129_v11 = vperm.slane %v102_v9, 0  ;;  %v521_v8 = vstv %s1000_s6 }
  0x90   :  { %v130_v13 = vsub.f32 %v129_v11, %v128_v10 }
  0x92   :  { %v131_v14 = vadd.f32 %v130_v13, %v78_v12 }
  0x94   :  { %v132_v15 = vmax.f32 %v131_v14, 0.0  ;;  %v159_v57 = vpop.permute.xlu0 %158 }
  0x95   :  { %vm161_vm7 = vcmp.ne.s32.totalorder %v159_v57, %v836_v50 }
  0x96   :  { %vm133_vm2 = vcmp.eq.f32.partialorder %v132_v15, 0.0  ;;  %vm162_vm11 = vmand %vm156_vm6, %vm161_vm7  ;;  %vm660_vm6 = vcmp.ne.s32.totalorder %v950_v3, 7 }
  0x97   :  { %v793_v17 = vsel %vm133_vm2, 1.0, %v908_v16  ;;  %vm996_vm2 = vmand %vm450_vm14, %vm452_vm15  ;;  %vm522_vm14 = vcmp.eq.s32.totalorder %v972_v35, %v521_v8 }
  0x98   :  { %v136_v18 = vmul.f32 1e-08, %v793_v17  ;;  %v150_v28 = vsub.f32 1.0, %v793_v17 }
  0x9a   :  { %v137_v19 = vadd.f32 %v136_v18, %v132_v15 }
  0x9c   :  { %833 = vrsqrt.f32 %v137_v19  ;;  %vm145_vm3 = vcmp.eq.f32.partialorder %v137_v19, inf  ;;  %v148_v27 = vand.u32 2147483648, %v137_v19  ;;  %vm147_vm4 = vcmp.eq.f32.partialorder %v137_v19, 0.0 }
  0xa2   :  { %v834_v20 = vpop.eup %833 }
  0xa3   :  { %v139_v21 = vmul.f32 %v834_v20, %v137_v19 }
  0xa5   :  { %v140_v22 = vmul.f32 %v834_v20, %v139_v21 }
  0xa7   :  { %v141_v23 = vmul.f32 0.5, %v140_v22  ;;  %v661_v22 = vstv %s1034_s3 }
  0xa8   :  { %vm662_vm7 = vcmp.eq.s32.totalorder %v972_v35, %v661_v22 }
  0xa9   :  { %v142_v24 = vsub.f32 1.5, %v141_v23 }
  0xab   :  { %v143_v25 = vmul.f32 %v834_v20, %v142_v24  ;;  %v723_v20 = vld [vmem:[#allocation5] sm:$0x1] }
  0xad   :  { %v144_v26 = vmul.f32 %v143_v25, %v137_v19 }
  0xaf   :  { %v146_v29 = vsel %vm145_vm3, %v137_v19, %v144_v26  ;;  %vm380_vm3 = vcmp.ne.s32.totalorder %v950_v3, 3 }
  0xb0   :  { %v149_v30 = vsel %vm147_vm4, %v148_v27, %v146_v29  ;;  %vm382_vm4 = vcmp.eq.s32.totalorder %v972_v35, %v381_v46 }
  0xb1   :  { %v151_v31 = vmul.f32 %v150_v28, %v149_v30  ;;  %vm1018_vm8 = vmand %vm380_vm3, %vm382_vm4 }
  0xb3   :  { %153 = vst.msk [vmem:[#allocation2] sm:$0xff] %vm152_vm5, %v151_v31 }
  0xba   :  { %v193_v41 = vld [vmem:[#allocation2 + $0x1] sm:$0x1]  ;;  %v171_v43 = vld [vmem:[#allocation2] sm:$0x1]  ;;  %v308_v44 = vld [vmem:[#allocation2 + $0x2] sm:$0x1] }
  0xbb   :  { %v163_v47 = vld [vmem:[#allocation2] sm:$0xff]  ;;  %v203_v51 = vsel %vm982_vm12, %v193_v41, -inf  ;;  %v181_v52 = vsel %vm986_vm13, %v171_v43, -inf  ;;  %v318_v53 = vsel %vm992_vm1, %v308_v44, -inf  ;;  %vm1029_vm12 = vmand %vm590_vm9, %vm592_vm10  ;;  %vm520_vm13 = vcmp.ne.s32.totalorder %v950_v3, 5 }
  0xbc   :  { %v448_v48 = vld [vmem:[#allocation2 + $0x4] sm:$0x1]  ;;  %v164_v55 = vsub.f32 1.0, %v163_v47  ;;  %v204_v58 = vperm.slane %v203_v51, 0  ;;  %v182_v59 = vperm.slane %v181_v52, 0  ;;  %v319_v60 = vperm.slane %v318_v53, 0  ;;  %vm1050_vm1 = vmand %vm520_vm13, %vm522_vm14 }
  0xbd   :  { %v458_v56 = vsel %vm996_vm2, %v448_v48, -inf  ;;  %v378_v63 = vld [vmem:[#allocation2 + $0x3] sm:$0x1]  ;;  %v588_v6 = vld [vmem:[#allocation2 + $0x6] sm:$0x1] }
  0xbe   :  { %v459_v62 = vperm.slane %v458_v56, 0  ;;  %v1024_v0 = vsel %vm162_vm11, %v164_v55, -inf  ;;  %v388_v9 = vsel %vm1018_vm8, %v378_v63, -inf  ;;  %v598_v14 = vsel %vm1029_vm12, %v588_v6, -inf  ;;  %v518_v19 = vld [vmem:[#allocation2 + $0x5] sm:$0x1]  ;;  %vm663_vm8 = vmand %vm660_vm6, %vm662_vm7 }
  0xbf   :  { %v205_v2 = vadd.f32 %v204_v58, %v1024_v0  ;;  %v183_v4 = vadd.f32 %v182_v59, %v1024_v0  ;;  %v320_v5 = vadd.f32 %v319_v60, %v1024_v0  ;;  %v389_v15 = vperm.slane %v388_v9, 0  ;;  %v658_v3 = vld [vmem:[#allocation2 + $0x7] sm:$0x1] }
  0xc0   :  { %v460_v13 = vadd.f32 %v459_v62, %v1024_v0  ;;  %v599_v18 = vperm.slane %v598_v14, 0  ;;  %v528_v23 = vsel %vm1050_vm1, %v518_v19, -inf  ;;  %v668_v32 = vsel %vm663_vm8, %v658_v3, -inf }
  0xc1   :  { %v206_v10 = vmax.f32 %v205_v2, 0.0  ;;  %v184_v11 = vmax.f32 %v183_v4, 0.0  ;;  %v321_v12 = vmax.f32 %v320_v5, 0.0  ;;  %v390_v21 = vadd.f32 %v389_v15, %v1024_v0 }
  0xc2   :  { %v461_v17 = vmax.f32 %v460_v13, 0.0  ;;  %v600_v24 = vadd.f32 %v599_v18, %v1024_v0  ;;  %v529_v28 = vperm.slane %v528_v23, 0  ;;  %v669_v36 = vperm.slane %v668_v32, 0 }
  0xc3   :  { %797 = vmatmul.msk.f32.vlgmr.msra.gmra.mxu2 %vm152_vm5, %v206_v10  ;;  %798 = vmatmul.msk.f32.vlgmr.msra.gmra.mxu3 %vm152_vm5, %v184_v11  ;;  %vm322_vm15 = vcmp.gt.f32.partialorder %v321_v12, 1e-08  ;;  %vm207_vm2 = vcmp.gt.f32.partialorder %v206_v10, 1e-08  ;;  %vm185_vm3 = vcmp.gt.f32.partialorder %v184_v11, 1e-08 }
  0xc4   :  { %803 = vmatmul.msk.f32.vlgmr.msrb.gmra.mxu0 %vm152_vm5, %v321_v12  ;;  %v802_v16 = vsel %vm322_vm15, 1.0, %v906_v1  ;;  %413 = vmatpush.msra.mxu2 %v910_v34  ;;  %vm462_vm4 = vcmp.gt.f32.partialorder %v461_v17, 1e-08  ;;  %v796_v25 = vsel %vm207_vm2, 1.0, %v906_v1  ;;  %v794_v26 = vsel %vm185_vm3, 1.0, %v906_v1 }
  0xc5   :  { %804 = vmatmul.msk.f32.vlgmr.msrb.gmra.mxu1 %vm152_vm5, %v802_v16  ;;  %437 = vmatpush.msra.mxu3 %v910_v34  ;;  %v391_v27 = vmax.f32 %v390_v21, 0.0  ;;  %v810_v29 = vsel %vm462_vm4, 1.0, %v906_v1  ;;  %v601_v30 = vmax.f32 %v600_v24, 0.0  ;;  %v530_v31 = vadd.f32 %v529_v28, %v1024_v0  ;;  %v735_v21 = vld [vmem:[#allocation7] sm:$0x1] }
  0xc6   :  { %623 = vmatpush.msrb.mxu0 %v910_v34  ;;  %647 = vmatpush.msrb.mxu1 %v910_v34  ;;  %v670_v38 = vadd.f32 %v669_v36, %v1024_v0 }
  0xc7   :  { %vm392_vm9 = vcmp.gt.f32.partialorder %v391_v27, 1e-08  ;;  %vm602_vm10 = vcmp.gt.f32.partialorder %v601_v30, 1e-08  ;;  %v531_v35 = vmax.f32 %v530_v31, 0.0 }
  0xc8   :  { %v806_v33 = vsel %vm392_vm9, 1.0, %v906_v1  ;;  %v818_v37 = vsel %vm602_vm10, 1.0, %v906_v1  ;;  %v671_v40 = vmax.f32 %v670_v38, 0.0 }
  0xc9   :  { %vm532_vm11 = vcmp.gt.f32.partialorder %v531_v35, 1e-08 }
  0xca   :  { %v814_v39 = vsel %vm532_vm11, 1.0, %v906_v1  ;;  %vm672_vm12 = vcmp.gt.f32.partialorder %v671_v40, 1e-08 }
  0xcb   :  { %799 = vmatmul.msk.f32.vlgmr.msrb.gmra.mxu2 %vm152_vm5, %v796_v25  ;;  %800 = vmatmul.msk.f32.vlgmr.msrb.gmra.mxu3 %vm152_vm5, %v794_v26  ;;  %v822_v41 = vsel %vm672_vm12, 1.0, %v906_v1 }
  0xcc   :  { %811 = vmatmul.msk.f32.vlgmr.msra.gmra.mxu0 %vm152_vm5, %v461_v17  ;;  %553 = vmatpush.msrb.mxu2 %v910_v34 }
  0xcd   :  { %812 = vmatmul.msk.f32.vlgmr.msra.gmra.mxu1 %vm152_vm5, %v810_v29  ;;  %577 = vmatpush.msrb.mxu3 %v910_v34 }
  0xd3   :  { %807 = vmatmul.msk.f32.vlgmr.msra.gmra.mxu2 %vm152_vm5, %v391_v27  ;;  %808 = vmatmul.msk.f32.vlgmr.msra.gmra.mxu3 %vm152_vm5, %v806_v33 }
  0xd4   :  { %819 = vmatmul.msk.f32.vlgmr.msrb.gmra.mxu0 %vm152_vm5, %v601_v30  ;;  %693 = vmatpush.msra.mxu2 %v910_v34 }
  0xd5   :  { %820 = vmatmul.msk.f32.vlgmr.msrb.gmra.mxu1 %vm152_vm5, %v818_v37  ;;  %717 = vmatpush.msra.mxu3 %v910_v34 }
  0xdb   :  { %815 = vmatmul.msk.f32.vlgmr.msrb.gmra.mxu2 %vm152_vm5, %v531_v35  ;;  %816 = vmatmul.msk.f32.vlgmr.msrb.gmra.mxu3 %vm152_vm5, %v814_v39 }
  0xe3   :  { %823 = vmatmul.msk.f32.vlgmr.msra.gmra.mxu2 %vm152_vm5, %v671_v40  ;;  %824 = vmatmul.msk.f32.vlgmr.msra.gmra.mxu3 %vm152_vm5, %v822_v41  ;;  %vm724_vm5 = vcmask 7168  }
 0x141   :  { %v345_v45 = vpop.f32.mrf.mxu0 }
 0x142   :  { %v369_v46 = vpop.f32.mrf.mxu1 }
 0x146   :  { %v231_v42 = vpop.f32.mrf.mxu2  ;;  %v254_v43 = vpop.f32.mrf.mxu3 }
 0x147   :  { %v255_v47 = vadd.f32 %v254_v43, %v231_v42 }
 0x149   :  { %v348_v51 = vadd.f32 %v345_v45, %v255_v47  ;;  %v485_v53 = vpop.f32.mrf.mxu0 }
 0x14a   :  { %v509_v54 = vpop.f32.mrf.mxu1 }
 0x14e   :  { %v277_v34 = vpop.f32.mrf.mxu2  ;;  %v300_v44 = vpop.f32.mrf.mxu3 }
 0x14f   :  { %v301_v48 = vadd.f32 %v300_v44, %v277_v34 }
 0x151   :  { %v372_v52 = vadd.f32 %v369_v46, %v301_v48  ;;  %v625_v62 = vpop.f32.mrf.mxu0 }
 0x152   :  { %v649_v63 = vpop.f32.mrf.mxu1 }
 0x156   :  { %v415_v49 = vpop.f32.mrf.mxu2  ;;  %v439_v50 = vpop.f32.mrf.mxu3 }
 0x157   :  { %v418_v55 = vadd.f32 %v415_v49, %v348_v51  ;;  %v442_v1 = vadd.f32 %v439_v50, %v372_v52 }
 0x159   :  { %v488_v58 = vadd.f32 %v485_v53, %v418_v55  ;;  %v512_v59 = vadd.f32 %v509_v54, %v442_v1 }
 0x15e   :  { %v555_v56 = vpop.f32.mrf.mxu2  ;;  %v579_v57 = vpop.f32.mrf.mxu3 }
 0x15f   :  { %v558_v60 = vadd.f32 %v555_v56, %v488_v58  ;;  %v582_v61 = vadd.f32 %v579_v57, %v512_v59 }
 0x161   :  { %v628_v0 = vadd.f32 %v625_v62, %v558_v60  ;;  %v652_v2 = vadd.f32 %v649_v63, %v582_v61 }
 0x166   :  { %v695_v4 = vpop.f32.mrf.mxu2  ;;  %v719_v5 = vpop.f32.mrf.mxu3 }
 0x167   :  { %v698_v6 = vadd.f32 %v695_v4, %v628_v0  ;;  %v722_v7 = vadd.f32 %v719_v5, %v652_v2 }
 0x169   :  { %v725_v8 = vsel %vm724_vm5, %v698_v6, 0.0  ;;  %v736_v9 = vsel %vm724_vm5, %v722_v7, 0.0 }
 0x16a   :  { %v726_v10 = vrot.slane %v725_v8, 4  ;;  %v737_v11 = vrot.slane %v736_v9, 4 }
 0x16c   :  { %v727_v12 = vadd.f32 %v726_v10, %v725_v8  ;;  %v738_v13 = vadd.f32 %v737_v11, %v736_v9 }
 0x16e   :  { %v728_v14 = vrot.slane %v727_v12, 2  ;;  %v739_v15 = vrot.slane %v738_v13, 2 }
 0x170   :  { %v729_v16 = vadd.f32 %v728_v14, %v727_v12  ;;  %v740_v17 = vadd.f32 %v739_v15, %v738_v13 }
 0x172   :  { %v730_v18 = vrot.slane %v729_v16, 1  ;;  %v741_v19 = vrot.slane %v740_v17, 1 }
 0x174   :  { %v731_v22 = vadd.f32 %v730_v18, %v729_v16  ;;  %v742_v23 = vadd.f32 %v741_v19, %v740_v17 }
 0x176   :  { %v732_v24 = vadd.f32 %v731_v22, %v723_v20  ;;  %v743_v25 = vadd.f32 %v742_v23, %v735_v21 }
 0x178   :  { %734 = vst.msk [vmem:[#allocation5] sm:$0x1] %vm33_vm0, %v732_v24 }
 0x179   :  { %755 = dma.vmem_to_hbm [thread:$0]  %s751_s10, 16, %s753_s13, [#allocation6]   ;;  %744 = vst.msk [vmem:[#allocation7] sm:$0x1] %vm33_vm0, %v743_v25 }
 0x17a   :  { %766 = dma.vmem_to_hbm [thread:$0]  %s762_s15, 16, %s764_s18, [#allocation8]  }
 0x17b   :  { %901 = dma.done.wait [#allocation6], 16  }
 0x17c   :  { %902 = vsyncadd [#allocation6], 4294967280 }
 0x17d   :  { %903 = dma.done.wait [#allocation8], 16  }
 0x17e   :  { %904 = vsyncadd [#allocation8], 4294967280 }
 0x17f   :  { %775 = vsyncpa [#allocation6], 1 }
 0x180   :  { %776 = vsyncpa [#allocation8], 1 }

</bundles_post_ra>
